<compile_context>
chip_gen: v7x
topology: tpu7x:2x2x1
jax: 0.10.0
libtpu: 0.0.40
codegen_flags: <defaults>
</compile_context>

<pallas_src>
import functools

import jax
import jax.numpy as jnp
from jax import lax
from jax.experimental import pallas as pl
from jax.experimental.pallas import tpu as pltpu


def _layernorm(x_f32, gamma, beta, *, hidden, h_pad, eps):
    """Row-wise LayerNorm over the true `hidden` dims of a zero-padded (rows, h_pad) tile."""
    inv_h = 1.0 / float(hidden)
    mean = jnp.sum(x_f32, axis=-1, keepdims=True) * inv_h          # pad lanes are zero
    xc = x_f32 - mean
    # Each zero-padded lane contributes mean^2 to sum(xc^2); subtract that out exactly.
    var = (jnp.sum(xc * xc, axis=-1, keepdims=True)
           - float(h_pad - hidden) * mean * mean) * inv_h
    var = jnp.maximum(var, 0.0)
    inv_std = lax.rsqrt(var + eps)
    return xc * inv_std * gamma + beta


def _vmem_table_kernel(ids_ref, table_ref, gamma_ref, beta_ref, out_ref,
                       *, tile_n, hidden, h_pad, eps):
    """Table resident in VMEM: dynamic-slice gather straight into the output block + LN.

    ids_ref   : SMEM (N_pad,) int32        -- scalar-prefetched token ids
    table_ref : VMEM (V, H_pad)            -- whole table (native dtype)
    gamma_ref : VMEM (1, H_pad) f32
    beta_ref  : VMEM (1, H_pad) f32
    out_ref   : VMEM (tile_n, H_pad)       -- output block (native dtype)
    """
    i = pl.program_id(0)
    base = i * tile_n

    # TODO(synk): a vectorized jnp.take gather (tpu.dynamic_gather) would cut the per-row
    # load/store loop; kept as a simple unrolled loop for robust lowering.
    def gather(r, carry):
        row = ids_ref[base + r]            # out-of-range ids are not validated (PyTorch raises)
        out_ref[pl.ds(r, 1), :] = table_ref[pl.ds(row, 1), :]
        return carry

    lax.fori_loop(0, tile_n, gather, 0, unroll=min(8, tile_n))

    x = out_ref[...].astype(jnp.float32)
    y = _layernorm(x, gamma_ref[...], beta_ref[...], hidden=hidden, h_pad=h_pad, eps=eps)
    # Dropout with hidden_dropout_prob=0 is the identity.
    out_ref[...] = y.astype(out_ref.dtype)


def _hbm_gather_kernel(ids_ref, emb_hbm, gamma_ref, beta_ref, out_ref,
                       gbuf, sem, *, tile_n, chunk, hidden, h_pad, eps):
    """Table in HBM: double-buffered chunked DMA row-gather + LN.

    ids_ref : SMEM (N_pad,) int32
    emb_hbm : ANY  (V, H_pad)                -- embedding table, stays in HBM
    gbuf    : VMEM (2, chunk, H_pad)         -- double-buffered gather scratch (native dtype)
    sem     : DMA semaphores (2,)            -- ONE aggregated semaphore per slot
    """
    i = pl.program_id(0)
    base = i * tile_n
    n_chunks = tile_n // chunk

    def start_chunk(c, slot):
        # Issue `chunk` row-gather DMAs; all of them signal the SAME per-slot semaphore.
        def issue(r, carry):
            row = ids_ref[base + c * chunk + r]
            pltpu.make_async_copy(
                emb_hbm.at[pl.ds(row, 1), :],
                gbuf.at[slot, pl.ds(r, 1), :],
                sem.at[slot],
            ).start()
            return carry
        # Fully unrolled: descriptor issue (misc slot) interleaves with the VPU LayerNorm.
        lax.fori_loop(0, chunk, issue, 0, unroll=True)

    def wait_chunk(slot):
        # One aggregated wait per chunk: the descriptor spans the whole slot buffer, so its
        # byte count equals the sum of the `chunk` row copies that signalled sem.at[slot].
        pltpu.make_async_copy(
            emb_hbm.at[pl.ds(0, chunk), :],
            gbuf.at[slot],
            sem.at[slot],
        ).wait()

    # Prime the pipeline with the first chunk of rows.
    start_chunk(0, 0)

    gamma = gamma_ref[...]
    beta = beta_ref[...]

    @pl.loop(0, n_chunks)
    def _(c):
        slot = c & 1

        # Prefetch the next chunk into the other buffer while this one is processed.
        @pl.when(c + 1 < n_chunks)
        def _():
            start_chunk(c + 1, 1 - slot)

        wait_chunk(slot)

        x = gbuf[slot].astype(jnp.float32)
        y = _layernorm(x, gamma, beta, hidden=hidden, h_pad=h_pad, eps=eps)
        start = pl.multiple_of(c * chunk, chunk)
        # Dropout with hidden_dropout_prob=0 is the identity.
        out_ref[pl.ds(start, chunk), :] = y.astype(out_ref.dtype)


def _choose_tiles(n):
    """Pick (tokens per grid step, rows per gather chunk); tile_n % chunk == 0, chunk % 8 == 0."""
    chunk = 64
    if n >= 4096:
        tile_n = 1024
    elif n >= 1024:
        tile_n = 512
    elif n >= 256:
        tile_n = 128          # keeps n_tiles >= 2 so the parallel axis can split across cores
    else:
        chunk = 8
        tile_n = max(chunk, pl.cdiv(n, 2 * chunk) * chunk)   # aim for ~2 tiles
    return tile_n, chunk


def transtab_word_embedding(input_ids, emb_table, gamma, beta, *,
                            eps=1e-5, force_hbm_gather=False):
    """Forward of TransTabWordEmbedding.

    input_ids: (B, S) int; emb_table: (V, H); gamma/beta: (H,).
    Returns (B, S, H) in emb_table.dtype.
    """
    B, S = input_ids.shape
    V, H = emb_table.shape
    N = B * S
    out_dtype = emb_table.dtype

    # Lane-dense hidden dim. No-op (and no table copy) when H is already a multiple of 128.
    H_pad = pl.cdiv(H, 128) * 128
    emb = emb_table                                   # native dtype, no full-table cast
    gamma_f32 = gamma.astype(jnp.float32).reshape(1, H)
    beta_f32 = beta.astype(jnp.float32).reshape(1, H)
    if H_pad != H:
        emb = jnp.pad(emb, ((0, 0), (0, H_pad - H)))
        gamma_f32 = jnp.pad(gamma_f32, ((0, 0), (0, H_pad - H)))
        beta_f32 = jnp.pad(beta_f32, ((0, 0), (0, H_pad - H)))

    tile_n, chunk = _choose_tiles(N)
    n_tiles = pl.cdiv(N, tile_n)
    N_pad = n_tiles * tile_n

    ids = input_ids.reshape(-1).astype(jnp.int32)
    if N_pad != N:
        ids = jnp.pad(ids, (0, N_pad - N))            # padded tail (id 0) is sliced off below

    itemsize = jnp.dtype(out_dtype).itemsize
    table_bytes = V * H_pad * itemsize
    out_block_bytes = 2 * tile_n * H_pad * itemsize   # double-buffered output block
    try:
        vmem_cap = int(pltpu.get_tpu_info().vmem_capacity_bytes)
    except Exception:
        vmem_cap = 64 * 1024 * 1024                   # conservative (v7x per-TC physical)

    # VMEM-resident-table fast path: budget 2x table (constant-index block may still be
    # double-buffered) plus working buffers, with headroom. Generation-aware via vmem_cap.
    vmem_table_need = 2 * table_bytes + out_block_bytes + 8 * H_pad * 4 + (2 << 20)
    use_vmem_table = (not force_hbm_gather) and vmem_table_need <= int(0.85 * vmem_cap)

    if use_vmem_table:
        kernel = functools.partial(_vmem_table_kernel, tile_n=tile_n,
                                   hidden=H, h_pad=H_pad, eps=eps)
        grid_spec = pltpu.PrefetchScalarGridSpec(
            num_scalar_prefetch=1,                    # ids -> SMEM
            grid=(n_tiles,),
            in_specs=[
                pl.BlockSpec((V, H_pad), lambda i, ids_ref: (0, 0)),   # table resident in VMEM
                pl.BlockSpec((1, H_pad), lambda i, ids_ref: (0, 0)),
                pl.BlockSpec((1, H_pad), lambda i, ids_ref: (0, 0)),
            ],
            out_specs=pl.BlockSpec((tile_n, H_pad), lambda i, ids_ref: (i, 0)),
        )
        vmem_limit = int(min(max(vmem_table_need, 32 << 20), vmem_cap))
    else:
        if V < chunk:                                 # keep the aggregated-wait descriptor valid
            chunk = 8
        kernel = functools.partial(_hbm_gather_kernel, tile_n=tile_n, chunk=chunk,
                                   hidden=H, h_pad=H_pad, eps=eps)
        grid_spec = pltpu.PrefetchScalarGridSpec(
            num_scalar_prefetch=1,
            grid=(n_tiles,),
            in_specs=[
                pl.BlockSpec(memory_space=pl.ANY),    # table stays in HBM
                pl.BlockSpec((1, H_pad), lambda i, ids_ref: (0, 0)),
                pl.BlockSpec((1, H_pad), lambda i, ids_ref: (0, 0)),
            ],
            out_specs=pl.BlockSpec((tile_n, H_pad), lambda i, ids_ref: (i, 0)),
            scratch_shapes=[
                pltpu.VMEM((2, chunk, H_pad), out_dtype),   # double-buffered gather scratch
                pltpu.SemaphoreType.DMA((2,)),              # ONE aggregated semaphore per slot
            ],
        )
        hbm_need = out_block_bytes + 2 * chunk * H_pad * itemsize + 8 * H_pad * 4 + (2 << 20)
        vmem_limit = int(min(max(hbm_need, 32 << 20), vmem_cap))

    out = pl.pallas_call(
        kernel,
        out_shape=jax.ShapeDtypeStruct((N_pad, H_pad), out_dtype),
        grid_spec=grid_spec,
        compiler_params=pltpu.CompilerParams(
            dimension_semantics=("parallel",),        # token tiles split across TCs (v7x)
            vmem_limit_bytes=vmem_limit,
        ),
    )(ids, emb, gamma_f32, beta_f32)

    return out[:N, :H].reshape(B, S, H)


if __name__ == "__main__":
    # Small, deterministic setup consistent with the module's forward.
    vocab_size = 128
    hidden_dim = 32
    batch, seq = 2, 8

    key = jax.random.PRNGKey(0)
    k_ids, k_emb = jax.random.split(key)

    # nn.Embedding weight then kaiming_normal_ (fan_in=hidden_dim, gain=sqrt(2)).
    # kaiming_normal_ runs after nn.Embedding zeroes padding_idx, so row 0 is NOT zero.
    kaiming_std = (2.0 / hidden_dim) ** 0.5
    emb_table = kaiming_std * jax.random.normal(
        k_emb, (vocab_size, hidden_dim), dtype=jnp.float32)

    # LayerNorm default params: weight=1, bias=0.
    gamma = jnp.ones((hidden_dim,), dtype=jnp.float32)
    beta = jnp.zeros((hidden_dim,), dtype=jnp.float32)

    input_ids = jax.random.randint(k_ids, (batch, seq), 0, vocab_size, dtype=jnp.int32)

    # Pure-JAX reference of the module forward (dropout p=0 is identity).
    ref_emb = emb_table[input_ids]                                  # (B, S, H)
    mu = ref_emb.mean(-1, keepdims=True)
    var = ((ref_emb - mu) ** 2).mean(-1, keepdims=True)
    ref = (ref_emb - mu) / jnp.sqrt(var + 1e-5) * gamma + beta

    # Path 1: VMEM-resident-table gather (auto-selected for this table size).
    out_vmem = jax.block_until_ready(
        transtab_word_embedding(input_ids, emb_table, gamma, beta, eps=1e-5))
    # Path 2: HBM DMA row-gather (forced, exercises the large-table path).
    out_hbm = jax.block_until_ready(
        transtab_word_embedding(input_ids, emb_table, gamma, beta, eps=1e-5,
                                force_hbm_gather=True))

    assert out_vmem.shape == (batch, seq, hidden_dim)
    assert out_hbm.shape == (batch, seq, hidden_dim)
    assert jnp.allclose(out_vmem, ref, atol=2e-5, rtol=2e-5), "VMEM-table path mismatch"
    assert jnp.allclose(out_hbm, ref, atol=2e-5, rtol=2e-5), "HBM gather path mismatch"
    print("KERNEL_OK")
</pallas_src>

<mosaic_0001>
module attributes {stable_mosaic.version = 11 : i64} {
  func.func @_vmem_table_kernel(%arg0: i32, %arg1: memref<16xi32, #tpu.memory_space<smem>>, %arg2: memref<128x128xf32, #tpu.memory_space<vmem>>, %arg3: memref<1x128xf32, #tpu.memory_space<vmem>>, %arg4: memref<1x128xf32, #tpu.memory_space<vmem>>, %arg5: memref<8x128xf32, #tpu.memory_space<vmem>>) attributes {dimension_semantics = [#tpu.dimension_semantics<parallel>], iteration_bounds = array<i64: 2>, scalar_prefetch = 1 : i64, scratch_operands = 0 : i64, tpu.core_type = #tpu.core_type<tc>, window_params = [{pipeline_mode = #tpu.pipeline_mode<synchronous>, transform_indices = @transform_0, window_bounds = array<i64: 128, 128>}, {pipeline_mode = #tpu.pipeline_mode<synchronous>, transform_indices = @transform_1, window_bounds = array<i64: 1, 128>}, {pipeline_mode = #tpu.pipeline_mode<synchronous>, transform_indices = @transform_2, window_bounds = array<i64: 1, 128>}, {transform_indices = @transform_3, window_bounds = array<i64: 8, 128>}]} {
    %c8_i32 = arith.constant 8 : i32
    %0 = arith.muli %arg0, %c8_i32 : i32
    %c0_i32 = arith.constant 0 : i32
    %1 = arith.addi %0, %c0_i32 : i32
    %2 = arith.index_cast %1 : i32 to index
    %3 = memref.load %arg1[%2] : memref<16xi32, #tpu.memory_space<smem>>
    %4 = arith.index_cast %3 : i32 to index
    %c0 = arith.constant 0 : index
    %5 = vector.load %arg2[%4, %c0] : memref<128x128xf32, #tpu.memory_space<vmem>>, vector<1x128xf32>
    %6 = arith.index_cast %c0_i32 : i32 to index
    %c0_0 = arith.constant 0 : index
    %7 = vector.load %arg5[%6, %c0_0] : memref<8x128xf32, #tpu.memory_space<vmem>>, vector<1x128xf32>
    tpu.vector_store %arg5[%6, %c0_0], %5 {strides = array<i32>} : memref<8x128xf32, #tpu.memory_space<vmem>>, vector<1x128xf32>,
    %c1_i32 = arith.constant 1 : i32
    %8 = arith.addi %0, %c1_i32 : i32
    %9 = arith.index_cast %8 : i32 to index
    %10 = memref.load %arg1[%9] : memref<16xi32, #tpu.memory_space<smem>>
    %11 = arith.index_cast %10 : i32 to index
    %c0_1 = arith.constant 0 : index
    %12 = vector.load %arg2[%11, %c0_1] : memref<128x128xf32, #tpu.memory_space<vmem>>, vector<1x128xf32>
    %13 = arith.index_cast %c1_i32 : i32 to index
    %c0_2 = arith.constant 0 : index
    %14 = vector.load %arg5[%13, %c0_2] : memref<8x128xf32, #tpu.memory_space<vmem>>, vector<1x128xf32>
    tpu.vector_store %arg5[%13, %c0_2], %12 {strides = array<i32>} : memref<8x128xf32, #tpu.memory_space<vmem>>, vector<1x128xf32>,
    %c2_i32 = arith.constant 2 : i32
    %15 = arith.addi %0, %c2_i32 : i32
    %16 = arith.index_cast %15 : i32 to index
    %17 = memref.load %arg1[%16] : memref<16xi32, #tpu.memory_space<smem>>
    %18 = arith.index_cast %17 : i32 to index
    %c0_3 = arith.constant 0 : index
    %19 = vector.load %arg2[%18, %c0_3] : memref<128x128xf32, #tpu.memory_space<vmem>>, vector<1x128xf32>
    %20 = arith.index_cast %c2_i32 : i32 to index
    %c0_4 = arith.constant 0 : index
    %21 = vector.load %arg5[%20, %c0_4] : memref<8x128xf32, #tpu.memory_space<vmem>>, vector<1x128xf32>
    tpu.vector_store %arg5[%20, %c0_4], %19 {strides = array<i32>} : memref<8x128xf32, #tpu.memory_space<vmem>>, vector<1x128xf32>,
    %c3_i32 = arith.constant 3 : i32
    %22 = arith.addi %0, %c3_i32 : i32
    %23 = arith.index_cast %22 : i32 to index
    %24 = memref.load %arg1[%23] : memref<16xi32, #tpu.memory_space<smem>>
    %25 = arith.index_cast %24 : i32 to index
    %c0_5 = arith.constant 0 : index
    %26 = vector.load %arg2[%25, %c0_5] : memref<128x128xf32, #tpu.memory_space<vmem>>, vector<1x128xf32>
    %27 = arith.index_cast %c3_i32 : i32 to index
    %c0_6 = arith.constant 0 : index
    %28 = vector.load %arg5[%27, %c0_6] : memref<8x128xf32, #tpu.memory_space<vmem>>, vector<1x128xf32>
    tpu.vector_store %arg5[%27, %c0_6], %26 {strides = array<i32>} : memref<8x128xf32, #tpu.memory_space<vmem>>, vector<1x128xf32>,
    %c4_i32 = arith.constant 4 : i32
    %29 = arith.addi %0, %c4_i32 : i32
    %30 = arith.index_cast %29 : i32 to index
    %31 = memref.load %arg1[%30] : memref<16xi32, #tpu.memory_space<smem>>
    %32 = arith.index_cast %31 : i32 to index
    %c0_7 = arith.constant 0 : index
    %33 = vector.load %arg2[%32, %c0_7] : memref<128x128xf32, #tpu.memory_space<vmem>>, vector<1x128xf32>
    %34 = arith.index_cast %c4_i32 : i32 to index
    %c0_8 = arith.constant 0 : index
    %35 = vector.load %arg5[%34, %c0_8] : memref<8x128xf32, #tpu.memory_space<vmem>>, vector<1x128xf32>
    tpu.vector_store %arg5[%34, %c0_8], %33 {strides = array<i32>} : memref<8x128xf32, #tpu.memory_space<vmem>>, vector<1x128xf32>,
    %c5_i32 = arith.constant 5 : i32
    %36 = arith.addi %0, %c5_i32 : i32
    %37 = arith.index_cast %36 : i32 to index
    %38 = memref.load %arg1[%37] : memref<16xi32, #tpu.memory_space<smem>>
    %39 = arith.index_cast %38 : i32 to index
    %c0_9 = arith.constant 0 : index
    %40 = vector.load %arg2[%39, %c0_9] : memref<128x128xf32, #tpu.memory_space<vmem>>, vector<1x128xf32>
    %41 = arith.index_cast %c5_i32 : i32 to index
    %c0_10 = arith.constant 0 : index
    %42 = vector.load %arg5[%41, %c0_10] : memref<8x128xf32, #tpu.memory_space<vmem>>, vector<1x128xf32>
    tpu.vector_store %arg5[%41, %c0_10], %40 {strides = array<i32>} : memref<8x128xf32, #tpu.memory_space<vmem>>, vector<1x128xf32>,
    %c6_i32 = arith.constant 6 : i32
    %43 = arith.addi %0, %c6_i32 : i32
    %44 = arith.index_cast %43 : i32 to index
    %45 = memref.load %arg1[%44] : memref<16xi32, #tpu.memory_space<smem>>
    %46 = arith.index_cast %45 : i32 to index
    %c0_11 = arith.constant 0 : index
    %47 = vector.load %arg2[%46, %c0_11] : memref<128x128xf32, #tpu.memory_space<vmem>>, vector<1x128xf32>
    %48 = arith.index_cast %c6_i32 : i32 to index
    %c0_12 = arith.constant 0 : index
    %49 = vector.load %arg5[%48, %c0_12] : memref<8x128xf32, #tpu.memory_space<vmem>>, vector<1x128xf32>
    tpu.vector_store %arg5[%48, %c0_12], %47 {strides = array<i32>} : memref<8x128xf32, #tpu.memory_space<vmem>>, vector<1x128xf32>,
    %c7_i32 = arith.constant 7 : i32
    %50 = arith.addi %0, %c7_i32 : i32
    %51 = arith.index_cast %50 : i32 to index
    %52 = memref.load %arg1[%51] : memref<16xi32, #tpu.memory_space<smem>>
    %53 = arith.index_cast %52 : i32 to index
    %c0_13 = arith.constant 0 : index
    %54 = vector.load %arg2[%53, %c0_13] : memref<128x128xf32, #tpu.memory_space<vmem>>, vector<1x128xf32>
    %55 = arith.index_cast %c7_i32 : i32 to index
    %c0_14 = arith.constant 0 : index
    %56 = vector.load %arg5[%55, %c0_14] : memref<8x128xf32, #tpu.memory_space<vmem>>, vector<1x128xf32>
    tpu.vector_store %arg5[%55, %c0_14], %54 {strides = array<i32>} : memref<8x128xf32, #tpu.memory_space<vmem>>, vector<1x128xf32>,
    %c8_i32_15 = arith.constant 8 : i32
    %c0_16 = arith.constant 0 : index
    %c0_17 = arith.constant 0 : index
    %57 = vector.load %arg5[%c0_16, %c0_17] : memref<8x128xf32, #tpu.memory_space<vmem>>, vector<8x128xf32>
    %c0_18 = arith.constant 0 : index
    %c0_19 = arith.constant 0 : index
    %58 = vector.load %arg3[%c0_18, %c0_19] : memref<1x128xf32, #tpu.memory_space<vmem>>, vector<1x128xf32>
    %c0_20 = arith.constant 0 : index
    %c0_21 = arith.constant 0 : index
    %59 = vector.load %arg4[%c0_20, %c0_21] : memref<1x128xf32, #tpu.memory_space<vmem>>, vector<1x128xf32>
    %cst = arith.constant dense<0.000000e+00> : vector<8xf32>
    %60 = vector.multi_reduction <add>, %57, %cst [1] : vector<8x128xf32> to vector<8xf32>
    %61 = vector.shape_cast %60 : vector<8xf32> to vector<8x1xf32>
    %cst_22 = arith.constant 3.125000e-02 : f32
    %62 = vector.broadcast %cst_22 : f32 to vector<8x1xf32>
    %63 = arith.mulf %61, %62 : vector<8x1xf32>
    %64 = vector.broadcast %63 : vector<8x1xf32> to vector<8x128xf32>
    %65 = arith.subf %57, %64 : vector<8x128xf32>
    %66 = arith.mulf %65, %65 : vector<8x128xf32>
    %cst_23 = arith.constant dense<0.000000e+00> : vector<8xf32>
    %67 = vector.multi_reduction <add>, %66, %cst_23 [1] : vector<8x128xf32> to vector<8xf32>
    %68 = vector.shape_cast %67 : vector<8xf32> to vector<8x1xf32>
    %cst_24 = arith.constant 9.600000e+01 : f32
    %69 = vector.broadcast %cst_24 : f32 to vector<8x1xf32>
    %70 = arith.mulf %69, %63 : vector<8x1xf32>
    %71 = arith.mulf %70, %63 : vector<8x1xf32>
    %72 = arith.subf %68, %71 : vector<8x1xf32>
    %cst_25 = arith.constant 3.125000e-02 : f32
    %73 = vector.broadcast %cst_25 : f32 to vector<8x1xf32>
    %74 = arith.mulf %72, %73 : vector<8x1xf32>
    %cst_26 = arith.constant 0.000000e+00 : f32
    %75 = vector.broadcast %cst_26 : f32 to vector<8x1xf32>
    %76 = arith.maximumf %74, %75 : vector<8x1xf32>
    %cst_27 = arith.constant 9.99999974E-6 : f32
    %77 = vector.broadcast %cst_27 : f32 to vector<8x1xf32>
    %78 = arith.addf %76, %77 : vector<8x1xf32>
    %79 = math.rsqrt %78 : vector<8x1xf32>
    %80 = vector.broadcast %79 : vector<8x1xf32> to vector<8x128xf32>
    %81 = arith.mulf %65, %80 : vector<8x128xf32>
    %82 = vector.broadcast %58 : vector<1x128xf32> to vector<8x128xf32>
    %83 = arith.mulf %81, %82 : vector<8x128xf32>
    %84 = vector.broadcast %59 : vector<1x128xf32> to vector<8x128xf32>
    %85 = arith.addf %83, %84 : vector<8x128xf32>
    %c0_28 = arith.constant 0 : index
    %c0_29 = arith.constant 0 : index
    %86 = vector.load %arg5[%c0_28, %c0_29] : memref<8x128xf32, #tpu.memory_space<vmem>>, vector<8x128xf32>
    tpu.vector_store %arg5[%c0_28, %c0_29], %85 {strides = array<i32>} : memref<8x128xf32, #tpu.memory_space<vmem>>, vector<8x128xf32>,
    return
  }
  func.func @transform_0(%arg0: i32, %arg1: memref<16xi32, #tpu.memory_space<smem>>) -> (i32, i32) {
    %c0_i32 = arith.constant 0 : i32
    %c0_i32_0 = arith.constant 0 : i32
    %c0_i32_1 = arith.constant 0 : i32
    return %c0_i32, %c0_i32_0 : i32, i32
  }
  func.func @transform_1(%arg0: i32, %arg1: memref<16xi32, #tpu.memory_space<smem>>) -> (i32, i32) {
    %c0_i32 = arith.constant 0 : i32
    %c0_i32_0 = arith.constant 0 : i32
    %c0_i32_1 = arith.constant 0 : i32
    return %c0_i32, %c0_i32_0 : i32, i32
  }
  func.func @transform_2(%arg0: i32, %arg1: memref<16xi32, #tpu.memory_space<smem>>) -> (i32, i32) {
    %c0_i32 = arith.constant 0 : i32
    %c0_i32_0 = arith.constant 0 : i32
    %c0_i32_1 = arith.constant 0 : i32
    return %c0_i32, %c0_i32_0 : i32, i32
  }
  func.func @transform_3(%arg0: i32, %arg1: memref<16xi32, #tpu.memory_space<smem>>) -> (i32, i32) {
    %c0_i32 = arith.constant 0 : i32
    %c0_i32_0 = arith.constant 0 : i32
    return %arg0, %c0_i32 : i32, i32
  }
}

</mosaic_0001>

<bundles_post_ra>
// kernel: tpu_custom_call.1
= control target key start
LH: loop header
LB: loop body
LE: loop exit
PB: predicated region body
PF: predicated region fallthrough
CT: control target
= control target key end

     0   :  { %s695_s0 = inlined_call_operand.hbm [shape: s32[16], index: 0, kind: input, shape index: {}]   ;;  %s696_s1 = inlined_call_operand.hbm [shape: f32[128,128], index: 1, kind: input, shape index: {}]   ;;  %s697_s2 = inlined_call_operand.vmem [shape: f32[1,128], index: 2, kind: input, shape index: {}]   ;;  %s698_s3 = inlined_call_operand.vmem [shape: f32[1,128], index: 3, kind: input, shape index: {}]   ;;  %s699_s4 = inlined_call_operand.hbm [shape: f32[16,128], index: 4, kind: output, shape index: {}]  }
   0x1   :  { %s391_s17 = scalar_lea.hbm %s695_s0, 16 }
   0x2   :  { %p392_p0 = scmp.ne.s32.totalorder %s695_s0, %s391_s17  ;;  %p395_p1 = scmp.lt.u32.totalorder %s391_s17, %s695_s0 }
   0x4   :  { %p397_p2 = pnand %p395_p1, %p392_p0 }
   0x6   :  { %400 = shalt.err (!%p397_p2)  }
   0x7   :  { %s499_s22 = smov [#allocation3]  }
   0x8   :  { %10 = dma.hbm_to_smem %s695_s0, 16, %s499_s22, [#allocation2] }
   0x9   :  { %473 = dma.done.wait [#allocation2], 16 }
   0xa   :  { %474 = vsyncadd [#allocation2], 4294967280 }
   0xb   :  { %12 = sfence }
   0xc   :  { %13 = vsyncpa [#allocation5], 0 }
   0xd   :  { %14 = vsyncpa [#allocation6], 0 }
   0xe   :  { %16 = vsyncpa [#allocation6 + $0x1], 0  ;;  %s541_s25 = smov 0   ;;  %s543_s26 = smov 0  }
   0xf   :  { %s545_s27 = smov 0   ;;  %s547_s28 = smov 0  }
  0x10 LB: > { %s562_s0 = sadd.s32 4294967295, %s497_s28   ;;  %s323_s29 = sadd.s32 4294967294, %s497_s28   ;;  %s497_s28 = sphi %s547_s28, %s715_s28   ;;  %s493_s27 = sphi %s545_s27, %s714_s27   ;;  %s489_s26 = sphi %s543_s26, %s713_s26   ;;  %s485_s25 = sphi %s541_s25, %s712_s25  }
  0x11   : > { %s566_s30 = sadd.s32 1, %s497_s28   ;;  %s92_s5 = sadd.s32 1, %s493_s27 }
  0x12   : > { %s89_s6 = ssub.s32 %s497_s28, %s566_s30  ;;  %p102_p3 = scmp.ne.s32.totalorder %s493_s27, %s489_s26 }
  0x13   : > { %p90_p4 = scmp.eq.s32.totalorder %s89_s6, 0  ;;  %p103_p5 = scmp.eq.s32.totalorder %s562_s0, 1 }
  0x14   : > { %p108_p6 = scmp.ne.s32.totalorder %s489_s26, %s485_s25  ;;  %p109_p7 = scmp.eq.s32.totalorder %s323_s29, 1 }
  0x15   : > { %s577_s7 = scalar_select %p90_p4, %s493_s27, %s92_s5  }
  0x16   : > { %p579_p8 = por %p103_p5, %p102_p3  ;;  %p583_p9 = por %p109_p7, %p108_p6 }
  0x17   : > { %p324_p10 = scmp.ge.s32.totalorder %s497_s28, 1  ;;  %p116_p11 = scmp.lt.s32.totalorder %s497_s28, 3 }
  0x18   : > { %s703_s8 = scalar_select %p579_p8, 1, 0 }
  0x19   : > { %s704_s9 = scalar_select %p583_p9, 1, 0 }
  0x1a   : > { %p700_p12 = scmp.eq.s32.totalorder %s562_s0, 0  ;;  %p590_p13 = pnand %p324_p10, %p116_p11 }
  0x1b   : > { %s500_s11 = smov [#allocation4]   ;;  %s401_s16 = scalar_lea.hbm %s696_s1, 2048 }
  0x1c   : > { %s705_s10 = scalar_select %p590_p13, 1, 0 }
  0x1d   : > { %s128_s12 = sshll.u32 %s500_s11, 4  ;;  %p342_p0 = pneg %p590_p13  ;;  %s129_s12 = int_to_ptr.vmem [resolvable:$true] %s128_s12 }
  0x1e   : > { %p402_p2 = scmp.ne.s32.totalorder %s696_s1, %s401_s16  ;;  %p408_p6 = scmp.lt.u32.totalorder %s401_s16, %s696_s1 }
  0x1f   : > { %p598_p1 = pnand %p700_p12, %p342_p0 }
  0x21   : > { %p403_p3 = pneg %p598_p1 }
  0x23   : > { %p404_p4 = pnand %p403_p3, %p402_p2 }
  0x25   : > { %p405_p5 = pneg %p404_p4 }
  0x27   : > { %p410_p7 = pnand %p408_p6, %p405_p5 }
  0x29   : > { %413 = shalt.err (!%p410_p7)
}
  0x2a   : > { %s414_s21 = scalar_lea.vmem %s129_s12, 2048  ;;  %p422_p12 = scmp.lt.s32.totalorder %s129_s12, %s129_s12 }
  0x2b   : > { %p415_p10 = scmp.ne.s32.totalorder %s129_s12, %s414_s21  ;;  %p423_p9 = scmp.lt.s32.totalorder %s414_s21, %s414_s21 }
  0x2d   : > { %p417_p11 = pnand %p415_p10, %p403_p3  ;;  %p424_p8 = por %p423_p9, %p422_p12 }
  0x2f   : > { %p418_p0 = pneg %p417_p11 }
  0x31   : > { %p425_p13 = pnand %p424_p8, %p418_p0 }
  0x33   : > { %428 = shalt.err (!%p425_p13)
}
  0x34   : > { %s501_s22 = smov 128   ;;  %s502_s23 = smov 8  }
  0x35   : > { %345 = dma.hbm_to_vmem [thread:$0]  (!%p598_p1), %s696_s1, 2048, %s129_s12, [#allocation5], %s501_s22, %s501_s22, %s502_s23  }
  0x36   : > { %p707_p2 = scmp.ne.s32.totalorder %s705_s10, 0 }
  0x37   : > { %p708_p4 = scmp.eq.s32.totalorder (!%p707_p2), %s562_s0, 0 }
  0x38   : > { %150 = sbr.rel (%p707_p2) target bundleno = 419 (0x1a3), region = 32 }
  0x3f   : > { %476 = dma.done.wait (%p708_p4), [#allocation5], 2048   ;;  %p709_p3 = pmov %p708_p4 }
  0x40   : > { %s166_s5 = sand.u32 1, %s489_s26   ;;  %s329_s6 = sshll.u32 %s562_s0, 3  ;;  %v330_v21 = vld [vmem:[%s697_s2] ss:$0 sm:$0xff] }
  0x41   : > { %478 = vsyncadd (%p709_p3), [#allocation5], 4294965248  ;;  %s328_s11 = sshll.u32 %s166_s5, 3  ;;  %s170_s13 = sld [smem:[#allocation3 + %s329_s6]]  ;;  %v331_v23 = vld [vmem:[%s698_s3] ss:$0 sm:$0xff] }
  0x42   : > { %s174_s14 = sadd.s32 1, %s329_s6  ;;  %s179_s12 = sadd.s32 2, %s329_s6 }
  0x43   : > { %s175_s15 = sld [smem:[#allocation3 + %s174_s14]]  ;;  %s184_s10 = sadd.s32 3, %s329_s6 }
  0x44   : > { %s180_s16 = sld [smem:[#allocation3 + %s179_s12]]  ;;  %s189_s18 = sadd.s32 4, %s329_s6 }
  0x45   : > { %s185_s17 = sld [smem:[#allocation3 + %s184_s10]]  ;;  %s194_s20 = sadd.s32 5, %s329_s6 }
  0x46   : > { %s190_s19 = sld [smem:[#allocation3 + %s189_s18]]  ;;  %s199_s23 = sadd.s32 6, %s329_s6 }
  0x47   : > { %s195_s21 = sld [smem:[#allocation3 + %s194_s20]]  ;;  %s171_s22 = scalar_lea.vmem [#allocation4], %s170_s13 }
  0x48   : > { %v172_v0 = vld [vmem:[%s171_s22] sm:$0x1]  ;;  %s204_s24 = sadd.s32 7, %s329_s6  ;;  %s628_s29 = scalar_lea.vmem [#allocation7], %s328_s11 }
  0x49   : > { %173 = vst [vmem:[%s628_s29] sm:$0x1] %v172_v0  ;;  %s200_s14 = sld [smem:[#allocation3 + %s199_s23]]  ;;  %s176_s12 = scalar_lea.vmem [#allocation4], %s175_s15 }
  0x4a   : > { %v177_v1 = vld [vmem:[%s176_s12] sm:$0x1]  ;;  %s205_s10 = sld [smem:[#allocation3 + %s204_s24]]  ;;  %s181_s18 = scalar_lea.vmem [#allocation4], %s180_s16 }
  0x4b   : > { %178 = vst [vmem:[%s628_s29 + $0x1] sm:$0x1] %v177_v1  ;;  %v182_v2 = vld [vmem:[%s181_s18] sm:$0x1]  ;;  %s186_s6 = scalar_lea.vmem [#allocation4], %s185_s17  ;;  %s333_s22 = sshll.u32 %s562_s0, 7 }
  0x4c   : > { %183 = vst [vmem:[%s628_s29 + $0x2] sm:$0x1] %v182_v2  ;;  %v187_v3 = vld [vmem:[%s186_s6] sm:$0x1]  ;;  %s191_s11 = scalar_lea.vmem [#allocation4], %s190_s19  ;;  %s256_s23 = sshll.u32 %s628_s29, 4  ;;  %s652_s23 = int_to_ptr.vmem [resolvable:$true] %s256_s23 }
  0x4d   : > { %188 = vst [vmem:[%s628_s29 + $0x3] sm:$0x1] %v187_v3  ;;  %v192_v4 = vld [vmem:[%s191_s11] sm:$0x1]  ;;  %s196_s13 = scalar_lea.vmem [#allocation4], %s195_s21  ;;  %s650_s12 = scalar_lea.hbm %s699_s4, %s333_s22 }
  0x4e   : > { %193 = vst [vmem:[%s628_s29 + $0x4] sm:$0x1] %v192_v4  ;;  %v197_v5 = vld [vmem:[%s196_s13] sm:$0x1]  ;;  %s429_s18 = scalar_lea.vmem %s652_s23, 128  ;;  %p710_p9 = scmp.ne.s32.totalorder %s703_s8, 0 }
  0x4f   : > { %198 = vst [vmem:[%s628_s29 + $0x5] sm:$0x1] %v197_v5  ;;  %s201_s20 = scalar_lea.vmem [#allocation4], %s200_s14  ;;  %p430_p8 = scmp.ne.s32.totalorder %s652_s23, %s429_s18 }
  0x50   : > { %v202_v6 = vld [vmem:[%s201_s20] sm:$0x1]  ;;  %s206_s15 = scalar_lea.vmem [#allocation4], %s205_s10  ;;  %s243_s10 = scalar_lea.sflag [#allocation6], %s166_s5 }
  0x51   : > { %203 = vst [vmem:[%s628_s29 + $0x6] sm:$0x1] %v202_v6  ;;  %v207_v7 = vld [vmem:[%s206_s15] sm:$0x1]  ;;  %p431_p12 = pnand %p430_p8, %p710_p9  ;;  %s503_s0 = smov [#allocation7]  }
  0x52   : > { %208 = vst [vmem:[%s628_s29 + $0x7] sm:$0x1] %v207_v7  ;;  %s433_s6 = sshll.u32 %s503_s0, 4  ;;  %s434_s6 = int_to_ptr.vmem [resolvable:$false] %s433_s6 }
  0x53   : > { %p432_p13 = pneg %p431_p12  ;;  %s435_s11 = scalar_lea.vmem %s434_s6, 256 }
  0x54   : > { %p436_p1 = scmp.lt.s32.totalorder %s652_s23, %s434_s6  ;;  %p437_p5 = scmp.lt.s32.totalorder %s435_s11, %s429_s18 }
  0x56   : > { %p438_p6 = por %p437_p5, %p436_p1 }
  0x58   : > { %p439_p7 = pnand %p438_p6, %p432_p13 }
  0x59   : > { %v209_v8 = vld [vmem:[%s628_s29] sm:$0xff] }
  0x5a   : > { %212 = vadd.xlane.f32.xlu0 %v209_v8 }
  0xe7   : > { %v213_v9 = vpop.xlane.xlu0 %212 }
  0xe8   : > { %v214_v10 = vmul.f32 0.03125, %v213_v9 }
  0xea   : > { %v215_v11 = vsub.f32 %v209_v8, %v214_v10  ;;  %v219_v13 = vmul.f32 96.0, %v214_v10 }
  0xec   : > { %v216_v12 = vmul.f32 %v215_v11, %v215_v11  ;;  %v220_v14 = vmul.f32 %v219_v13, %v214_v10 }
  0xee   : > { %217 = vadd.xlane.f32.xlu0 %v216_v12 }
 0x17b   : > { %v218_v15 = vpop.xlane.xlu0 %217 }
 0x17c   : > { %v221_v16 = vsub.f32 %v218_v15, %v220_v14 }
 0x17e   : > { %v222_v17 = vmul.f32 0.03125, %v221_v16 }
 0x180   : > { %v223_v18 = vmax.f32 %v222_v17, 0.0 }
 0x182   : > { %v224_v19 = vadd.f32 1e-05, %v223_v18 }
 0x184   : > { %389 = vrsqrt.f32 %v224_v19 }
 0x18e   : > { %v390_v20 = vpop.eup %389 }
 0x18f   : > { %v226_v22 = vmul.f32 %v390_v20, %v215_v11 }
 0x191   : > { %v233_v24 = vmul.f32 %v330_v21, %v226_v22 }
 0x193   : > { %v240_v25 = vadd.f32 %v331_v23, %v233_v24 }
 0x195   : > { %241 = vst [vmem:[%s628_s29] sm:$0xff] %v240_v25 }
 0x196   : > { %442 = shalt.err (!%p439_p7)
}
 0x197   : > { %s443_s5 = scalar_lea.hbm %s650_s12, 128  ;;  %s447_s20 = scalar_lea.hbm %s699_s4, 256 }
 0x198   : > { %p444_p10 = scmp.ne.s32.totalorder %s650_s12, %s443_s5  ;;  %p448_p2 = scmp.lt.u32.totalorder %s650_s12, %s699_s4 }
 0x199   : > { %p449_p4 = scmp.lt.u32.totalorder %s447_s20, %s443_s5  ;;  %p451_p8 = scmp.lt.u32.totalorder %s443_s5, %s650_s12 }
 0x19a   : > { %p445_p11 = pnand %p444_p10, %p710_p9 }
 0x19b   : > { %p450_p3 = por %p449_p4, %p448_p2 }
 0x19c   : > { %p446_p0 = pneg %p445_p11 }
 0x19d   : > { %p452_p12 = por %p451_p8, %p450_p3 }
 0x19f   : > { %p453_p13 = pnand %p452_p12, %p446_p0 }
 0x1a1   : > { %456 = shalt.err (!%p453_p13)
}
 0x1a2   : > { %340 = dma.vmem_to_hbm [thread:$0]  (%p710_p9), %s652_s23, 128, %s650_s12, %s243_s10  }
 0x1a3 PF: > { %p352_p1 = scmp.ge.s32.totalorder %s497_s28, 2  ;;  %s268_s17 = sand.u32 1, %s485_s25  }
 0x1a4   : > { %p711_p5 = scmp.ne.s32.totalorder %s704_s9, 0  ;;  %s269_s19 = scalar_lea.sflag [#allocation6], %s268_s17 }
 0x1a6   : > { %p347_p6 = pnand %p352_p1, %p711_p5 }
 0x1a8   : > { %480 = dma.done.wait (!%p347_p6), %s269_s19, 128  }
 0x1a9   : > { %482 = vsyncadd (!%p347_p6), %s269_s19, 4294967168  ;;  %p19_p7 = scmp.ge.s32.totalorder %s566_s30, 4   ;;  %s712_s25 = smov %s489_s26 }
 0x1aa   : > { %s713_s26 = smov %s493_s27  ;;  %s714_s27 = smov %s577_s7 }
 0x1ab   : > { %s715_s28 = smov %s566_s30  ;;  %21 = sbr.rel (!%p19_p7) target bundleno = 16 (0x10), region = 77 }
 0x1b2   :  { %274 = vsyncpa [#allocation5], 1 }
 0x1b3   :  { %276 = vsyncpa [#allocation5 + $0x1], 1 }
 0x1b4   :  { %277 = vsyncpa [#allocation6], 1 }
 0x1b5   :  { %279 = vsyncpa [#allocation6 + $0x1], 1 }

</bundles_post_ra>
